<compile_context>
chip_gen: v5e
topology: v5e:2x2
jax: 0.10.0
libtpu: 0.0.40
codegen_flags: <defaults>
</compile_context>

<pallas_src>
import functools

import jax
import jax.numpy as jnp
from jax.experimental import pallas as pl
from jax.experimental.pallas import tpu as pltpu


def _lwconv_kernel(x_ref, w_ref, b_ref, o_ref, *scratch,
                   K, padding, T_in, T_out, t_chunk, stage_f32):
    """One (channel-tile, batch) block per grid step, native (B, C, T) layout.

    x_ref: (1, c_tile, T_in)    time on lanes, channels on sublanes
    w_ref: (c_tile, K)          per-channel taps (f32, softmax pre-applied)
    b_ref: (c_tile, 1)          per-channel bias (f32, zeros if module bias is None)
    o_ref: (1, c_tile, T_out)   dense (stride-1) output block
    scratch[0] (only when stage_f32): (c_tile, T_out) f32 accumulator staging
    """
    w = w_ref[...]                 # (c_tile, K) f32 -- tiny, hoisted out of the loops
    bias = b_ref[...]              # (c_tile, 1) f32
    c_rows = w.shape[0]

    if stage_f32:
        acc_ref = scratch[0]

        def _read(lo, hi):
            return acc_ref[:, lo:hi]

        def _write(lo, hi, v):
            acc_ref[:, lo:hi] = v
    else:
        def _read(lo, hi):
            return o_ref[0, :, lo:hi].astype(jnp.float32)

        def _write(lo, hi, v):
            o_ref[0, :, lo:hi] = v.astype(o_ref.dtype)

    for t0 in range(0, T_out, t_chunk):
        t1 = min(t0 + t_chunk, T_out)
        width = t1 - t0
        # Bias-initialized f32 chunk accumulator (a value, not a VMEM ref): all
        # fully-valid taps FMA into it without per-tap accumulator VMEM traffic.
        acc = jnp.broadcast_to(bias, (c_rows, width)).astype(jnp.float32)
        edge_taps = []
        for k in range(K):
            lo = max(t0, padding - k)           # first valid output column for tap k
            hi = min(t1, T_in + padding - k)    # one past the last valid column
            if hi <= lo:
                continue
            src = lo + k - padding              # guaranteed in-range input column
            if lo == t0 and hi == t1:
                tap = x_ref[0, :, src:src + width].astype(jnp.float32)
                acc = acc + w[:, k:k + 1] * tap
            else:
                edge_taps.append((k, lo, hi, src))
        _write(t0, t1, acc)
        # Boundary taps (at most `padding` per side, only in the first / last
        # chunk): narrow in-range slices added straight onto the already-written
        # output columns -- no zero-padded VMEM copy of the input block.
        for k, lo, hi, src in edge_taps:
            tap = x_ref[0, :, src:src + (hi - lo)].astype(jnp.float32)
            _write(lo, hi, _read(lo, hi) + w[:, k:k + 1] * tap)

    if stage_f32:
        o_ref[0] = scratch[0][...].astype(o_ref.dtype)


def _vmem_ceiling_bytes():
    """VMEM request ceiling with headroom for Mosaic internal scratch: ~80% of
    physical (so v7x's 64 MiB is never fully requested), capped at ~100 MiB on
    the 128 MiB generations (v5e / v6e)."""
    cap = 64 << 20                       # conservative fallback if the query fails
    try:
        info = pltpu.get_tpu_info()
        cap = int(getattr(info, "vmem_capacity_bytes", cap))
    except Exception:
        pass
    return int(min(cap * 0.8, 100 << 20))


def _pick_c_tile(C, B, bytes_per_channel, budget_bytes):
    """Largest channel tile that is a multiple of 8 (sublane-aligned) and divides C
    while the double-buffered per-block working set stays inside budget_bytes.
    Falls back to a full-C block when C is not sublane-aligned.  Prefers >= 2
    total grid steps so both v7x TensorCores get work even at B == 1."""
    if C % 8 != 0:
        return C
    fits = [ct for ct in range(8, C + 1, 8)
            if C % ct == 0 and ct * bytes_per_channel <= budget_bytes]
    if not fits:
        return 8
    if B == 1:
        multi = [ct for ct in fits if C // ct >= 2]
        if multi:
            return max(multi)
    return max(fits)


def lightweight_conv1d(x, weight, bias, *, num_heads, stride=1, padding=0,
                       weight_softmax=False):
    """x: (B, C, T); weight: (num_heads, 1, K); bias: (num_heads,) or None."""
    B, C, T = x.shape
    H = num_heads
    if C % H != 0:
        raise ValueError(f"in_channels={C} not divisible by num_heads={H}")
    if stride < 1:
        raise ValueError("stride must be >= 1")
    c_per = C // H
    K = weight.shape[-1]
    # TODO(synk): depth_multiplier > 1 (weight.shape[0] == num_heads * dm) not supported.
    assert weight.shape[0] == H, "depth_multiplier > 1 not supported"
    if T + 2 * padding < K:
        raise ValueError(
            f"kernel_size={K} larger than padded input length {T + 2 * padding}")
    T_dense = T + 2 * padding - K + 1            # stride-1 (dense) output length

    # ---- parameter prep (tiny, hoisted out of the kernel) --------------------
    w = weight[:, 0, :].astype(jnp.float32)                     # (H, K)
    if weight_softmax:
        w = jax.nn.softmax(w, axis=-1)
    w_chan = jnp.repeat(w, c_per, axis=0)                       # (C, K) f32
    if bias is not None:
        b_chan = jnp.repeat(bias.astype(jnp.float32), c_per)[:, None]   # (C, 1)
    else:
        b_chan = jnp.zeros((C, 1), jnp.float32)

    # f32 staging only needed when boundary taps exist AND the output dtype would
    # otherwise be rounded per partial update.
    stage_f32 = (padding > 0) and (x.dtype != jnp.float32)
    t_chunk = 256                                 # lane-aligned accumulation chunk

    # ---- tiling / generation-aware VMEM budget --------------------------------
    in_item = jnp.dtype(x.dtype).itemsize
    bytes_per_channel = (2 * (T * in_item + T_dense * in_item + (K + 1) * 4)
                         + (T_dense * 4 if stage_f32 else 0)
                         + 4 * min(T_dense, t_chunk) * 4)       # f32 chunk temporaries
    ceiling = _vmem_ceiling_bytes()
    c_tile = _pick_c_tile(C, B, bytes_per_channel, int(ceiling * 0.6))
    n_c = C // c_tile
    est = c_tile * bytes_per_channel + (4 << 20)
    vmem_limit = int(min(max(est, 32 << 20), ceiling))

    kernel = functools.partial(
        _lwconv_kernel, K=K, padding=padding, T_in=T, T_out=T_dense,
        t_chunk=t_chunk, stage_f32=stage_f32)

    scratch_shapes = (
        [pltpu.VMEM((c_tile, T_dense), jnp.float32)] if stage_f32 else [])

    out_dense = pl.pallas_call(
        kernel,
        out_shape=jax.ShapeDtypeStruct((B, C, T_dense), x.dtype),
        grid=(n_c, B),                            # channels outer: params not re-DMA'd
        in_specs=[
            pl.BlockSpec((1, c_tile, T), lambda ci, b: (b, ci, 0)),
            pl.BlockSpec((c_tile, K), lambda ci, b: (ci, 0)),
            pl.BlockSpec((c_tile, 1), lambda ci, b: (ci, 0)),
        ],
        out_specs=pl.BlockSpec((1, c_tile, T_dense), lambda ci, b: (b, ci, 0)),
        scratch_shapes=scratch_shapes,
        compiler_params=pltpu.CompilerParams(
            dimension_semantics=("parallel", "parallel"),
            vmem_limit_bytes=vmem_limit),
    )(x, w_chan, b_chan)

    if stride == 1:
        return out_dense
    # TODO(synk): fold stride into the kernel (strided lane reads); stride > 1 is
    # rare for this module, so take a wrapper slice of the dense output for now.
    return out_dense[:, :, ::stride]


def _reference(x, weight, bias, *, num_heads, stride, padding, weight_softmax):
    """Plain-JAX reference mirroring F.conv1d(groups=num_heads) semantics."""
    B, C, T = x.shape
    c_per = C // num_heads
    w = weight[:, 0, :].astype(jnp.float32)
    if weight_softmax:
        w = jax.nn.softmax(w, axis=-1)
    K = w.shape[-1]
    xp = jnp.pad(x.astype(jnp.float32), ((0, 0), (0, 0), (padding, padding)))
    T_out = (T + 2 * padding - K) // stride + 1
    wc = jnp.repeat(w, c_per, axis=0)                          # (C, K)
    bc = (jnp.repeat(bias.astype(jnp.float32), c_per) if bias is not None
          else jnp.zeros((C,), jnp.float32))
    out = jnp.zeros((B, C, T_out), jnp.float32)
    for k in range(K):
        out = out + wc[None, :, k:k + 1] * xp[:, :, k:k + stride * (T_out - 1) + 1:stride]
    return (out + bc[None, :, None]).astype(x.dtype)


if __name__ == "__main__":
    # Module config (small, consistent with LightweightConv1d.__init__).
    in_channels = 32
    num_heads = 4
    kernel_size = 3
    stride = 1
    padding = 1
    weight_softmax = True
    use_bias = True

    B, C, T = 2, in_channels, 16

    key = jax.random.PRNGKey(0)
    kx, kw, kb = jax.random.split(key, 3)

    # Deterministic parameter init (xavier_uniform_ for the (H*dm, 1, K) tensor).
    fan_in = 1 * kernel_size
    fan_out = num_heads * kernel_size
    bound = (6.0 / (fan_in + fan_out)) ** 0.5
    weight = jax.random.uniform(kw, (num_heads, 1, kernel_size),
                                jnp.float32, -bound, bound)
    bias = (0.1 * jax.random.normal(kb, (num_heads,), jnp.float32)
            if use_bias else None)

    x = jax.random.normal(kx, (B, C, T), jnp.float32)

    out = lightweight_conv1d(
        x, weight, bias,
        num_heads=num_heads, stride=stride, padding=padding,
        weight_softmax=weight_softmax)
    out = jax.block_until_ready(out)

    ref = _reference(
        x, weight, bias,
        num_heads=num_heads, stride=stride, padding=padding,
        weight_softmax=weight_softmax)

    assert out.shape == ref.shape, (out.shape, ref.shape)
    assert jnp.allclose(out, ref, atol=1e-5, rtol=1e-5), float(
        jnp.max(jnp.abs(out - ref)))
    print("KERNEL_OK")
</pallas_src>

<mosaic_0001>
module attributes {stable_mosaic.version = 11 : i64} {
  func.func @_lwconv_kernel(%arg0: i32, %arg1: i32, %arg2: memref<1x32x16xf32, #tpu.memory_space<vmem>>, %arg3: memref<32x3xf32, #tpu.memory_space<vmem>>, %arg4: memref<32x1xf32, #tpu.memory_space<vmem>>, %arg5: memref<1x32x16xf32, #tpu.memory_space<vmem>>) attributes {dimension_semantics = [#tpu.dimension_semantics<parallel>, #tpu.dimension_semantics<parallel>], iteration_bounds = array<i64: 1, 2>, scalar_prefetch = 0 : i64, scratch_operands = 0 : i64, tpu.core_type = #tpu.core_type<tc>, window_params = [{transform_indices = @transform_0, window_bounds = array<i64: 1, 32, 16>}, {transform_indices = @transform_1, window_bounds = array<i64: 32, 3>}, {transform_indices = @transform_2, window_bounds = array<i64: 32, 1>}, {transform_indices = @transform_3, window_bounds = array<i64: 1, 32, 16>}]} {
    %c0 = arith.constant 0 : index
    %c0_0 = arith.constant 0 : index
    %0 = vector.load %arg3[%c0, %c0_0] : memref<32x3xf32, #tpu.memory_space<vmem>>, vector<32x3xf32>
    %c0_1 = arith.constant 0 : index
    %c0_2 = arith.constant 0 : index
    %1 = vector.load %arg4[%c0_1, %c0_2] : memref<32x1xf32, #tpu.memory_space<vmem>>, vector<32x1xf32>
    %2 = vector.shape_cast %1 : vector<32x1xf32> to vector<32x1xf32>
    %3 = vector.broadcast %2 : vector<32x1xf32> to vector<32x16xf32>
    %c0_3 = arith.constant 0 : index
    %c0_4 = arith.constant 0 : index
    %c0_5 = arith.constant 0 : index
    %4 = vector.load %arg2[%c0_3, %c0_4, %c0_5] : memref<1x32x16xf32, #tpu.memory_space<vmem>>, vector<1x32x16xf32>
    %5 = vector.shape_cast %4 : vector<1x32x16xf32> to vector<32x16xf32>
    %6 = vector.extract_strided_slice %0 {offsets = [0, 1], sizes = [32, 1], strides = [1, 1]} : vector<32x3xf32> to vector<32x1xf32>
    %7 = vector.broadcast %6 : vector<32x1xf32> to vector<32x16xf32>
    %8 = arith.mulf %7, %5 : vector<32x16xf32>
    %9 = arith.addf %3, %8 : vector<32x16xf32>
    %c0_6 = arith.constant 0 : index
    %c0_7 = arith.constant 0 : index
    %c0_8 = arith.constant 0 : index
    %10 = vector.load %arg5[%c0_6, %c0_7, %c0_8] : memref<1x32x16xf32, #tpu.memory_space<vmem>>, vector<1x32x16xf32>
    %11 = vector.shape_cast %10 : vector<1x32x16xf32> to vector<32x16xf32>
    %12 = vector.shape_cast %9 : vector<32x16xf32> to vector<1x32x16xf32>
    tpu.vector_store %arg5[%c0_6, %c0_7, %c0_8], %12 {strides = array<i32>} : memref<1x32x16xf32, #tpu.memory_space<vmem>>, vector<1x32x16xf32>,
    %c0_9 = arith.constant 0 : index
    %c0_10 = arith.constant 0 : index
    %c0_11 = arith.constant 0 : index
    %13 = vector.load %arg2[%c0_9, %c0_10, %c0_11] : memref<1x32x16xf32, #tpu.memory_space<vmem>>, vector<1x32x15xf32>
    %14 = vector.shape_cast %13 : vector<1x32x15xf32> to vector<32x15xf32>
    %c0_12 = arith.constant 0 : index
    %c0_13 = arith.constant 0 : index
    %c1 = arith.constant 1 : index
    %15 = vector.load %arg5[%c0_12, %c0_13, %c1] : memref<1x32x16xf32, #tpu.memory_space<vmem>>, vector<1x32x15xf32>
    %16 = vector.shape_cast %15 : vector<1x32x15xf32> to vector<32x15xf32>
    %17 = vector.extract_strided_slice %0 {offsets = [0, 0], sizes = [32, 1], strides = [1, 1]} : vector<32x3xf32> to vector<32x1xf32>
    %18 = vector.broadcast %17 : vector<32x1xf32> to vector<32x15xf32>
    %19 = arith.mulf %18, %14 : vector<32x15xf32>
    %20 = arith.addf %16, %19 : vector<32x15xf32>
    %c0_14 = arith.constant 0 : index
    %c0_15 = arith.constant 0 : index
    %c1_16 = arith.constant 1 : index
    %21 = vector.load %arg5[%c0_14, %c0_15, %c1_16] : memref<1x32x16xf32, #tpu.memory_space<vmem>>, vector<1x32x15xf32>
    %22 = vector.shape_cast %21 : vector<1x32x15xf32> to vector<32x15xf32>
    %23 = vector.shape_cast %20 : vector<32x15xf32> to vector<1x32x15xf32>
    tpu.vector_store %arg5[%c0_14, %c0_15, %c1_16], %23 {strides = array<i32>} : memref<1x32x16xf32, #tpu.memory_space<vmem>>, vector<1x32x15xf32>,
    %c0_17 = arith.constant 0 : index
    %c0_18 = arith.constant 0 : index
    %c1_19 = arith.constant 1 : index
    %24 = vector.load %arg2[%c0_17, %c0_18, %c1_19] : memref<1x32x16xf32, #tpu.memory_space<vmem>>, vector<1x32x15xf32>
    %25 = vector.shape_cast %24 : vector<1x32x15xf32> to vector<32x15xf32>
    %c0_20 = arith.constant 0 : index
    %c0_21 = arith.constant 0 : index
    %c0_22 = arith.constant 0 : index
    %26 = vector.load %arg5[%c0_20, %c0_21, %c0_22] : memref<1x32x16xf32, #tpu.memory_space<vmem>>, vector<1x32x15xf32>
    %27 = vector.shape_cast %26 : vector<1x32x15xf32> to vector<32x15xf32>
    %28 = vector.extract_strided_slice %0 {offsets = [0, 2], sizes = [32, 1], strides = [1, 1]} : vector<32x3xf32> to vector<32x1xf32>
    %29 = vector.broadcast %28 : vector<32x1xf32> to vector<32x15xf32>
    %30 = arith.mulf %29, %25 : vector<32x15xf32>
    %31 = arith.addf %27, %30 : vector<32x15xf32>
    %c0_23 = arith.constant 0 : index
    %c0_24 = arith.constant 0 : index
    %c0_25 = arith.constant 0 : index
    %32 = vector.load %arg5[%c0_23, %c0_24, %c0_25] : memref<1x32x16xf32, #tpu.memory_space<vmem>>, vector<1x32x15xf32>
    %33 = vector.shape_cast %32 : vector<1x32x15xf32> to vector<32x15xf32>
    %34 = vector.shape_cast %31 : vector<32x15xf32> to vector<1x32x15xf32>
    tpu.vector_store %arg5[%c0_23, %c0_24, %c0_25], %34 {strides = array<i32>} : memref<1x32x16xf32, #tpu.memory_space<vmem>>, vector<1x32x15xf32>,
    return
  }
  func.func @transform_0(%arg0: i32, %arg1: i32) -> (i32, i32, i32) {
    %c0_i32 = arith.constant 0 : i32
    %c0_i32_0 = arith.constant 0 : i32
    return %arg1, %arg0, %c0_i32 : i32, i32, i32
  }
  func.func @transform_1(%arg0: i32, %arg1: i32) -> (i32, i32) {
    %c0_i32 = arith.constant 0 : i32
    %c0_i32_0 = arith.constant 0 : i32
    return %arg0, %c0_i32 : i32, i32
  }
  func.func @transform_2(%arg0: i32, %arg1: i32) -> (i32, i32) {
    %c0_i32 = arith.constant 0 : i32
    %c0_i32_0 = arith.constant 0 : i32
    return %arg0, %c0_i32 : i32, i32
  }
  func.func @transform_3(%arg0: i32, %arg1: i32) -> (i32, i32, i32) {
    %c0_i32 = arith.constant 0 : i32
    %c0_i32_0 = arith.constant 0 : i32
    return %arg1, %arg0, %c0_i32 : i32, i32, i32
  }
}

</mosaic_0001>

<bundles_post_ra>
// kernel: tpu_custom_call.1
= control target key start
LH: loop header
LB: loop body
LE: loop exit
PB: predicated region body
PF: predicated region fallthrough
CT: control target
= control target key end

     0   :  { %s646_s12 = smov 0   ;;  %s648_s13 = smov 0   ;;  %s741_s0 = inlined_call_operand.vmem [shape: f32[2,32,16], index: 0, kind: input, shape index: {}]   ;;  %s742_s1 = inlined_call_operand.vmem [shape: f32[32,3], index: 1, kind: input, shape index: {}]   ;;  %s743_s2 = inlined_call_operand.vmem [shape: f32[32,1], index: 2, kind: input, shape index: {}]   ;;  %s744_s3 = inlined_call_operand.vmem [shape: f32[2,32,16], index: 3, kind: output, shape index: {}]  }
   0x1   :  { %s650_s14 = smov 0  }
   0x2 LB: > { %s22_s15 = sadd.s32 1, %s615_s13  ;;  %p548_p0 = scmp.ge.s32.totalorder %s619_s14, 1  ;;  %s619_s14 = sphi %s650_s14, %s13_s14   ;;  %s615_s13 = sphi %s648_s13, %s746_s13   ;;  %s611_s12 = sphi %s646_s12, %s745_s12  }
   0x3   : > { %p23_p1 = scmp.ge.s32.totalorder %s22_s15, 2  ;;  %p180_p2 = scmp.lt.s32.totalorder %s619_s14, 3 }
   0x5   : > { %s748_s15 = smov (%p23_p1, %s22_s15), 0  ;;  %p181_p3 = pnand %p548_p0, %p180_p2 }
   0x6   : > { %p223_p4 = scmp.lt.s32.totalorder (!%p181_p3), %s611_s12, 1  ;;  %s624_s9 = smov (!%p181_p3), 1  }
   0x7   : > { %184 = sbr.rel (%p181_p3) target bundleno = 283 (0x11b), region = 32 }
   0xc   : > { %v260_v0 = vld [vmem:[%s743_s2 + $0x10] sm:$0xff]  ;;  %v258_v1 = vld [vmem:[%s743_s2] sm:$0xff]  ;;  %v621_v3 = vmov 1   ;;  %v622_v4 = vmov 0   ;;  %v261_v5 = vld [vmem:[%s743_s2 + $0x18] sm:$0xff]  ;;  %v623_v10 = vmov 2  }
   0xd   : > { %v254_v2 = vld [vmem:[%s742_s1] sm:$0xff]  ;;  %588 = vset.pattern.permute.xlu2 %v621_v3  ;;  %587 = vset.pattern.permute.xlu1 %v622_v4  ;;  %v259_v6 = vld [vmem:[%s743_s2 + $0x8] sm:$0xff]  ;;  %v256_v7 = vld [vmem:[%s742_s1 + $0x10] sm:$0xff]  ;;  %s750_s12 = smov (!%p223_p4, %s611_s12), 1  ;;  %vm314_vm0 = vcmask 130048   ;;  %vm367_vm1 = vcmask 130056  }
   0xe   : > { %586 = vset.pattern.permute.xlu0 %v622_v4  ;;  %274 = vperm.xlu1 %587, %v260_v0   ;;  %v255_v8 = vld [vmem:[%s742_s1 + $0x8] sm:$0xff]  ;;  %v257_v9 = vld [vmem:[%s742_s1 + $0x18] sm:$0xff]  ;;  %s555_s5 = sshll.u32 %s750_s12, 5  ;;  %s625_s12 = smov 127   ;;  %vm420_vm2 = vcmask 121856  }
   0xf   : > { %264 = vperm.xlu0 %586, %v258_v1   ;;  %288 = vperm.xlu2 %588, %v254_v2   ;;  %s230_s8 = scalar_lea.vmem %s741_s0, %s555_s5  ;;  %s698_s16 = scalar_lea.vmem %s744_s3, %s555_s5 }
  0x10   : > { %v282_v12 = vld [vmem:[%s230_s8] sm:$0xff]  ;;  %v322_v15 = vld [vmem:[%s230_s8 + $0x18] sm:$0xff]  ;;  %v374_v21 = vld [vmem:[%s230_s8 + $0x10] sm:$0xff] }
  0x11   : > { %v283_v27 = vld [vmem:[%s230_s8 + $0x8] sm:$0xff] }
  0x16   : > { %279 = vperm.xlu1 %587, %v261_v5  }
  0x17   : > { %269 = vperm.xlu0 %586, %v259_v6   ;;  %589 = vset.pattern.permute.xlu2 %v622_v4 }
  0x18   : > { %328 = vperm.xlu2 %589, %v254_v2  }
  0x1e   : > { %336 = vperm.xlu1 %587, %v256_v7  }
  0x1f   : > { %332 = vperm.xlu0 %586, %v255_v8  }
  0x20   : > { %340 = vperm.xlu2 %589, %v257_v9  }
  0x26   : > { %591 = vset.pattern.permute.xlu1 %v623_v10 }
  0x27   : > { %590 = vset.pattern.permute.xlu0 %v623_v10  ;;  %385 = vperm.xlu1 %591, %v255_v8  }
  0x28   : > { %381 = vperm.xlu0 %590, %v254_v2   ;;  %592 = vset.pattern.permute.xlu2 %v623_v10 }
  0x29   : > { %389 = vperm.xlu2 %592, %v256_v7  }
  0x2f   : > { %393 = vperm.xlu1 %591, %v257_v9  }
  0x30   : > { %594 = vset.pattern.permute.xlu0 %v621_v3 }
  0x31   : > { %298 = vperm.xlu0 %594, %v256_v7   ;;  %593 = vset.pattern.permute.xlu2 %v621_v3 }
  0x32   : > { %293 = vperm.xlu2 %593, %v255_v8  }
  0x37   : > { %595 = vset.pattern.permute.xlu1 %v621_v3 }
  0x38   : > { %303 = vperm.xlu1 %595, %v257_v9  }
  0x39   : > { %596 = vset.pattern.permute.xlu0 %v623_v10 }
  0x69   : > { %v289_v11 = vpop.permute.xlu2 %288 }
  0x6a   : > { %v306_v18 = vmul.f32 %v289_v11, %v282_v12 }
  0x72   : > { %v329_v13 = vpop.permute.xlu2 %328 }
  0x73   : > { %v343_v14 = vmul.f32 %v329_v13, %v282_v12 }
  0x75   : > { %351 = vrot.lane.b32.xlu2 %v343_v14, %s624_s9 }
  0x7a   : > { %v341_v16 = vpop.permute.xlu2 %340 }
  0x7b   : > { %v346_v17 = vmul.f32 %v341_v16, %v322_v15 }
  0x7d   : > { %357 = vrot.lane.b32.xlu0 %v346_v17, %s624_s9 }
  0x80   : > { %v275_v19 = vpop.permute.xlu1 %274 }
  0x81   : > { %v265_v20 = vpop.permute.xlu0 %264 }
  0x82   : > { %v310_v22 = vadd.f32 %v306_v18, %v265_v20 }
  0x83   : > { %v390_v23 = vpop.permute.xlu2 %389 }
  0x84   : > { %315 = vst.msk [vmem:[%s698_s16] sm:$0xff] %vm314_vm0, %v310_v22  ;;  %v398_v24 = vmul.f32 %v390_v23, %v374_v21 }
  0x86   : > { %408 = vrot.lane.b32.xlu0 %v398_v24, %s625_s12 }
  0x88   : > { %v280_v25 = vpop.permute.xlu1 %279 }
  0x89   : > { %v270_v26 = vpop.permute.xlu0 %269 }
  0x8b   : > { %v323_v48 = vld [vmem:[%s698_s16] sm:$0xff] }
  0x8c   : > { %v294_v28 = vpop.permute.xlu2 %293 }
  0x8d   : > { %v307_v29 = vmul.f32 %v294_v28, %v283_v27 }
  0x8f   : > { %v311_v30 = vadd.f32 %v307_v29, %v270_v26 }
  0x90   : > { %v337_v31 = vpop.permute.xlu1 %336 }
  0x91   : > { %316 = vst.msk [vmem:[%s698_s16 + $0x8] sm:$0xff] %vm314_vm0, %v311_v30  ;;  %v345_v32 = vmul.f32 %v374_v21, %v337_v31  ;;  %v333_v33 = vpop.permute.xlu0 %332 }
  0x92   : > { %v344_v34 = vmul.f32 %v333_v33, %v283_v27 }
  0x93   : > { %355 = vrot.lane.b32.xlu2 %v345_v32, %s624_s9 }
  0x94   : > { %353 = vrot.lane.b32.xlu1 %v344_v34, %s624_s9 }
  0x98   : > { %v324_v60 = vld [vmem:[%s698_s16 + $0x8] sm:$0xff] }
  0x99   : > { %v386_v35 = vpop.permute.xlu1 %385 }
  0x9a   : > { %v397_v36 = vmul.f32 %v386_v35, %v283_v27  ;;  %v382_v37 = vpop.permute.xlu0 %381 }
  0x9b   : > { %v396_v38 = vmul.f32 %v382_v37, %v282_v12 }
  0x9c   : > { %406 = vrot.lane.b32.xlu2 %v397_v36, %s625_s12 }
  0x9d   : > { %404 = vrot.lane.b32.xlu1 %v396_v38, %s625_s12 }
  0xa1   : > { %v394_v39 = vpop.permute.xlu1 %393 }
  0xa2   : > { %v399_v40 = vmul.f32 %v394_v39, %v322_v15 }
  0xa3   : > { %v299_v41 = vpop.permute.xlu0 %298 }
  0xa4   : > { %v308_v42 = vmul.f32 %v374_v21, %v299_v41 }
  0xa5   : > { %410 = vrot.lane.b32.xlu1 %v399_v40, %s625_s12 }
  0xa6   : > { %v312_v43 = vadd.f32 %v308_v42, %v275_v19 }
  0xa8   : > { %317 = vst.msk [vmem:[%s698_s16 + $0x10] sm:$0xff] %vm314_vm0, %v312_v43 }
  0xaa   : > { %v304_v44 = vpop.permute.xlu1 %303 }
  0xab   : > { %v309_v45 = vmul.f32 %v322_v15, %v304_v44 }
  0xad   : > { %v313_v46 = vadd.f32 %v309_v45, %v280_v25 }
  0xaf   : > { %318 = vst.msk [vmem:[%s698_s16 + $0x18] sm:$0xff] %vm314_vm0, %v313_v46  ;;  %v325_v51 = vld [vmem:[%s698_s16 + $0x10] sm:$0xff] }
  0xb6   : > { %v326_v54 = vld [vmem:[%s698_s16 + $0x18] sm:$0xff] }
  0xcf   : > { %v352_v47 = vpop.permute.xlu2 %351 }
  0xd0   : > { %v363_v49 = vadd.f32 %v352_v47, %v323_v48 }
  0xd2   : > { %368 = vst.msk [vmem:[%s698_s16] sm:$0xff] %vm367_vm1, %v363_v49 }
  0xd9   : > { %v376_v63 = vld [vmem:[%s698_s16] sm:$0xff] }
  0xed   : > { %v356_v50 = vpop.permute.xlu2 %355 }
  0xee   : > { %v365_v52 = vadd.f32 %v356_v50, %v325_v51 }
  0xef   : > { %v358_v53 = vpop.permute.xlu0 %357 }
  0xf0   : > { %370 = vst.msk [vmem:[%s698_s16 + $0x10] sm:$0xff] %vm367_vm1, %v365_v52  ;;  %v366_v55 = vadd.f32 %v358_v53, %v326_v54 }
  0xf2   : > { %371 = vst.msk [vmem:[%s698_s16 + $0x18] sm:$0xff] %vm367_vm1, %v366_v55 }
  0xf6   : > { %v407_v0 = vpop.permute.xlu2 %406 }
  0xf7   : > { %v378_v56 = vld [vmem:[%s698_s16 + $0x10] sm:$0xff] }
  0xf8   : > { %v409_v57 = vpop.permute.xlu0 %408 }
  0xf9   : > { %v418_v58 = vadd.f32 %v409_v57, %v378_v56  ;;  %v379_v5 = vld [vmem:[%s698_s16 + $0x18] sm:$0xff] }
  0xfb   : > { %423 = vst.msk [vmem:[%s698_s16 + $0x10] sm:$0xff] %vm420_vm2, %v418_v58 }
 0x106   : > { %v354_v59 = vpop.permute.xlu1 %353 }
 0x107   : > { %v364_v61 = vadd.f32 %v354_v59, %v324_v60 }
 0x109   : > { %369 = vst.msk [vmem:[%s698_s16 + $0x8] sm:$0xff] %vm367_vm1, %v364_v61 }
 0x10f   : > { %v405_v62 = vpop.permute.xlu1 %404 }
 0x110   : > { %v377_v1 = vld [vmem:[%s698_s16 + $0x8] sm:$0xff]  ;;  %v416_v2 = vadd.f32 %v405_v62, %v376_v63 }
 0x111   : > { %v417_v3 = vadd.f32 %v407_v0, %v377_v1 }
 0x112   : > { %421 = vst.msk [vmem:[%s698_s16] sm:$0xff] %vm420_vm2, %v416_v2 }
 0x113   : > { %422 = vst.msk [vmem:[%s698_s16 + $0x8] sm:$0xff] %vm420_vm2, %v417_v3 }
 0x117   : > { %v411_v4 = vpop.permute.xlu1 %410 }
 0x118   : > { %v419_v6 = vadd.f32 %v411_v4, %v379_v5 }
 0x11a   : > { %424 = vst.msk [vmem:[%s698_s16 + $0x18] sm:$0xff] %vm420_vm2, %v419_v6 }
 0x11b PF: > { %s13_s14 = sadd.s32 1, %s619_s14   ;;  %s745_s12 = smov %s615_s13 }
 0x11c   : > { %p10_p5 = scmp.ge.s32.totalorder %s13_s14, 4   ;;  %s746_s13 = smov %s748_s15 }
 0x11e   :  { %12 = sbr.rel (!%p10_p5) target bundleno = 2 (0x2), region = 68 }

</bundles_post_ra>
